<compile_context>
chip_gen: v5e
topology: v5e:2x2
jax: 0.10.0
libtpu: 0.0.40
codegen_flags: <defaults>
</compile_context>

<pallas_src>
import jax
import jax.numpy as jnp
from jax.experimental import pallas as pl
from jax.experimental.pallas import tpu as pltpu

_LANE = 128           # full vreg lane width -> unmasked full-width stores
_MIN_GRID_STEPS = 4   # >=2 enables DMA pipelining; 4 (even) balances v7x's 2 TCs


def _round_up(x, m):
    return -(-x // m) * m


def _relu_kernel(x_ref, o_ref):
    # Pure VPU elementwise max(x, 0) over the whole VMEM tile.
    o_ref[...] = jnp.maximum(x_ref[...], jnp.zeros((), x_ref.dtype))


def _tpu_budget():
    """Return (target block bytes, vmem_limit_bytes), generation-aware."""
    try:
        vmem_phys = pltpu.get_tpu_info().vmem_capacity_bytes
    except Exception:
        vmem_phys = 64 * 1024 * 1024            # conservative: assume v7x-like
    if vmem_phys >= 128 * 1024 * 1024:
        # v5e / v6e: 128 MiB physical VMEM -> 8 MiB blocks, roomy limit.
        return 8 * 1024 * 1024, 48 * 1024 * 1024
    # v7x: 64 MiB VMEM per TensorCore -> keep 2*(in+out) buffers <= ~32 MiB.
    return 8 * 1024 * 1024, 40 * 1024 * 1024


def relu_pallas(x, *, donate=False):
    """Elementwise ReLU matching F.relu semantics (shape/dtype preserved)."""
    orig_shape = x.shape
    dtype = x.dtype
    n = x.size
    itemsize = jnp.dtype(dtype).itemsize
    lane = _LANE

    # Unaligned (or empty) sizes: XLA's fused jnp.maximum is already a single
    # read+write pass; the old slice/concatenate tail path tripled HBM traffic.
    if n == 0 or n % lane != 0:
        return jnp.maximum(x, jnp.zeros((), dtype))

    rows = n // lane
    x2d = x.reshape(rows, lane)                 # metadata-only reshape

    # Sublane multiple for packed dtypes: 8 (f32), 16 (bf16), 32 (int8/fp8).
    sublane_mult = max(8, 32 // itemsize)

    # Dtype-aware tile: ~8 MiB per block regardless of element size.
    target_block_bytes, vmem_limit = _tpu_budget()
    tile_rows = max(
        sublane_mult,
        (target_block_bytes // (lane * itemsize)) // sublane_mult * sublane_mult,
    )

    # Force >= _MIN_GRID_STEPS grid steps whenever rows allow, so the DMA
    # pipeline has work to overlap and v7x's two TensorCores both run.
    if rows > sublane_mult:
        split_tr = _round_up(pl.cdiv(rows, _MIN_GRID_STEPS), sublane_mult)
        tr = min(tile_rows, split_tr)           # multiple of sublane_mult
    else:
        tr = rows                               # full extent (tiny input)

    grid = (pl.cdiv(rows, tr),)                 # Pallas masks the partial tail

    out2d = pl.pallas_call(
        _relu_kernel,
        out_shape=jax.ShapeDtypeStruct((rows, lane), dtype),
        grid_spec=pltpu.PrefetchScalarGridSpec(
            num_scalar_prefetch=0,
            grid=grid,
            in_specs=[pl.BlockSpec((tr, lane), lambda i: (i, 0))],
            out_specs=pl.BlockSpec((tr, lane), lambda i: (i, 0)),
        ),
        compiler_params=pltpu.CompilerParams(
            # Parallel row axis -> grid steps shard across v7x's 2 TensorCores.
            dimension_semantics=("parallel",),
            vmem_limit_bytes=vmem_limit,
        ),
        # Purely bandwidth-bound: 1 read + 1 write of every element.
        cost_estimate=pl.CostEstimate(
            flops=n, transcendentals=0, bytes_accessed=2 * n * itemsize),
        # Opt-in: callers that donate x can reuse its HBM buffer for the output.
        input_output_aliases=({0: 0} if donate else {}),
    )(x2d)

    return out2d.reshape(orig_shape)


if __name__ == "__main__":
    key = jax.random.PRNGKey(0)
    # NCHW input, small shape: batch=2, channels=4, spatial=16x16
    x = jax.random.normal(key, (2, 4, 16, 16), dtype=jnp.float32)

    y = relu_pallas(x)
    jax.block_until_ready(y)

    # Sanity check against pure-JAX reference.
    ref = jnp.maximum(x, 0.0)
    assert y.shape == x.shape and y.dtype == x.dtype
    assert jnp.allclose(y, ref), "mismatch vs reference ReLU (f32)"

    # Exercise the dtype-aware tiling path (bf16 -> 16-row sublane multiple).
    xb = x.astype(jnp.bfloat16)
    yb = relu_pallas(xb)
    jax.block_until_ready(yb)
    assert jnp.array_equal(yb, jnp.maximum(xb, jnp.zeros((), jnp.bfloat16))), \
        "mismatch vs reference ReLU (bf16)"

    print("KERNEL_OK")
</pallas_src>

<mosaic_0001>
module attributes {stable_mosaic.version = 11 : i64} {
  func.func @_relu_kernel(%arg0: i32, %arg1: memref<8x128xf32, #tpu.memory_space<vmem>>, %arg2: memref<8x128xf32, #tpu.memory_space<vmem>>) attributes {dimension_semantics = [#tpu.dimension_semantics<parallel>], iteration_bounds = array<i64: 2>, scalar_prefetch = 0 : i64, scratch_operands = 0 : i64, tpu.core_type = #tpu.core_type<tc>, window_params = [{transform_indices = @transform_0, window_bounds = array<i64: 8, 128>}, {transform_indices = @transform_1, window_bounds = array<i64: 8, 128>}]} {
    %c0 = arith.constant 0 : index
    %c0_0 = arith.constant 0 : index
    %0 = vector.load %arg1[%c0, %c0_0] : memref<8x128xf32, #tpu.memory_space<vmem>>, vector<8x128xf32>
    %cst = arith.constant 0.000000e+00 : f32
    %1 = vector.broadcast %cst : f32 to vector<8x128xf32>
    %2 = arith.maximumf %0, %1 : vector<8x128xf32>
    %c0_1 = arith.constant 0 : index
    %c0_2 = arith.constant 0 : index
    %3 = vector.load %arg2[%c0_1, %c0_2] : memref<8x128xf32, #tpu.memory_space<vmem>>, vector<8x128xf32>
    tpu.vector_store %arg2[%c0_1, %c0_2], %2 {strides = array<i32>} : memref<8x128xf32, #tpu.memory_space<vmem>>, vector<8x128xf32>,
    return
  }
  func.func @transform_0(%arg0: i32) -> (i32, i32) {
    %c0_i32 = arith.constant 0 : i32
    %c0_i32_0 = arith.constant 0 : i32
    return %arg0, %c0_i32 : i32, i32
  }
  func.func @transform_1(%arg0: i32) -> (i32, i32) {
    %c0_i32 = arith.constant 0 : i32
    %c0_i32_0 = arith.constant 0 : i32
    return %arg0, %c0_i32 : i32, i32
  }
}

</mosaic_0001>

<bundles_post_ra>
// kernel: tpu_custom_call.1
= control target key start
LH: loop header
LB: loop body
LE: loop exit
PB: predicated region body
PF: predicated region fallthrough
CT: control target
= control target key end

     0   :  { %6 = vsyncpa [#allocation3], 0  ;;  %s516_s0 = inlined_call_operand.hbm [shape: f32[16,128], index: 0, kind: input, shape index: {}]   ;;  %s517_s1 = inlined_call_operand.hbm [shape: f32[16,128], index: 1, kind: output, shape index: {}]  }
   0x1   :  { %8 = vsyncpa [#allocation3 + $0x1], 0 }
   0x2   :  { %9 = vsyncpa [#allocation4], 0 }
   0x3   :  { %11 = vsyncpa [#allocation4 + $0x1], 0  ;;  %s389_s6 = smov 0   ;;  %s391_s7 = smov 0  }
   0x4   :  { %s393_s8 = smov 0   ;;  %s395_s9 = smov 0  }
   0x5 LB: > { %s410_s10 = sadd.s32 4294967295, %s377_s9   ;;  %s223_s11 = sadd.s32 4294967294, %s377_s9   ;;  %s377_s9 = sphi %s395_s9, %s527_s9   ;;  %s373_s8 = sphi %s393_s8, %s526_s8   ;;  %s369_s7 = sphi %s391_s7, %s525_s7   ;;  %s365_s6 = sphi %s389_s6, %s524_s6  }
   0x6   : > { %s414_s12 = sadd.s32 1, %s377_s9   ;;  %s24_s13 = sadd.s32 1, %s373_s8 }
   0x7   : > { %s21_s14 = ssub.s32 %s377_s9, %s414_s12  ;;  %p31_p0 = scmp.ne.s32.totalorder %s373_s8, %s369_s7 }
   0x8   : > { %p22_p1 = scmp.eq.s32.totalorder %s21_s14, 0  ;;  %p32_p2 = scmp.eq.s32.totalorder %s377_s9, 0 }
   0x9   : > { %p37_p3 = scmp.ne.s32.totalorder %s369_s7, %s365_s6  ;;  %p38_p4 = scmp.eq.s32.totalorder %s410_s10, 0 }
   0xa   : > { %s426_s15 = scalar_select %p22_p1, %s373_s8, %s24_s13  }
   0xb   : > { %p428_p5 = por %p32_p2, %p31_p0  ;;  %p432_p6 = por %p38_p4, %p37_p3 }
   0xc   : > { %p61_p7 = scmp.eq.s32.totalorder %s410_s10, 1  ;;  %p67_p8 = scmp.eq.s32.totalorder %s223_s11, 1 }
   0xd   : > { %p247_p10 = scmp.lt.s32.totalorder %s377_s9, 2  ;;  %s87_s20 = sand.u32 1, %s373_s8  }
   0xe   : > { %p439_p11 = por %p61_p7, %p31_p0  ;;  %p443_p12 = por %p67_p8, %p37_p3 }
   0xf   : > { %s227_s21 = sshll.u32 %s377_s9, 3  ;;  %s226_s22 = sshll.u32 %s87_s20, 3 }
  0x10   : > { %s95_s25 = scalar_lea.hbm %s516_s0, %s227_s21  ;;  %s91_s27 = scalar_lea.vmem [#allocation2], %s226_s22 }
  0x11   : > { %s97_s26 = sshll.u32 %s95_s25, 4  ;;  %s99_s28 = sshll.u32 %s91_s27, 4  ;;  %s98_s26 = int_to_ptr.hbm [resolvable:$true] %s97_s26  ;;  %s100_s28 = int_to_ptr.vmem [resolvable:$true] %s99_s28 }
  0x12   : > { %p454_p13 = pnand %p247_p10, %p428_p5  ;;  %p228_p0 = scmp.ge.s32.totalorder %s377_s9, 1 }
  0x13   : > { %p104_p1 = scmp.lt.s32.totalorder %s377_s9, 3  ;;  %s88_s30 = scalar_lea.sflag [#allocation3], %s87_s20 }
  0x14   : > { %s281_s2 = sshra.s32 %s98_s26, 4  ;;  %p285_p3 = pneg %p454_p13  ;;  %s282_s2 = int_to_ptr.hbm [resolvable:$true] %s281_s2 }
  0x15   : > { %s283_s3 = scalar_lea.hbm %s282_s2, 8  ;;  %s288_s11 = scalar_lea.hbm %s516_s0, 16 }
  0x16   : > { %p284_p2 = scmp.ne.s32.totalorder %s282_s2, %s283_s3  ;;  %p289_p5 = scmp.lt.s32.totalorder %s282_s2, %s516_s0 }
  0x17   : > { %p290_p8 = scmp.lt.s32.totalorder %s288_s11, %s283_s3 }
  0x18   : > { %p286_p4 = pnand %p285_p3, %p284_p2 }
  0x19   : > { %p291_p10 = por %p290_p8, %p289_p5 }
  0x1a   : > { %p287_p7 = pneg %p286_p4 }
  0x1c   : > { %p292_p9 = pnand %p291_p10, %p287_p7 }
  0x1e   : > { %295 = shalt.err (!%p292_p9)
}
  0x1f   : > { %242 = dma.hbm_to_vmem [thread:$0]  (!%p454_p13), %s98_s26, 128, %s100_s28, %s88_s30  }
  0x20   : > { %p105_p2 = pnand %p228_p0, %p104_p1 }
  0x21   : > { %s475_s16 = sand.u32 (!%p105_p2), 1, %s369_s7  }
  0x22   : > { %108 = sbr.rel (%p105_p2) target bundleno = 55 (0x37), region = 24  ;;  %s229_s20 = sshll.u32 (!%p105_p2), %s475_s16, 3 }
  0x23   : > { %s111_s21 = scalar_lea.sflag (!%p105_p2), [#allocation3], %s475_s16  ;;  %s114_s22 = scalar_lea.vmem (!%p105_p2), [#allocation2], %s229_s20 }
  0x27   : > { %356 = dma.done.wait (%p432_p6), %s111_s21, 128  }
  0x28   : > { %358 = vsyncadd (%p432_p6), %s111_s21, 4294967168  ;;  %s232_s23 = sshll.u32 %s410_s10, 3  ;;  %s133_s27 = scalar_lea.vmem [#allocation5], %s229_s20  ;;  %v134_v0 = vld [vmem:[%s114_s22] sm:$0xff] }
  0x29   : > { %s148_s26 = scalar_lea.hbm %s517_s1, %s232_s23  ;;  %s150_s28 = sshll.u32 %s133_s27, 4  ;;  %v135_v1 = vmax.f32 %v134_v0, 0.0  ;;  %s151_s28 = int_to_ptr.vmem [resolvable:$true] %s150_s28 }
  0x2a   : > { %s152_s29 = sshll.u32 %s148_s26, 4  ;;  %s138_s30 = scalar_lea.sflag [#allocation4], %s475_s16  ;;  %s153_s29 = int_to_ptr.hbm [resolvable:$true] %s152_s29 }
  0x2b   : > { %136 = vst [vmem:[%s133_s27] sm:$0xff] %v135_v1  ;;  %s325_s2 = sshra.s32 %s153_s29, 4  ;;  %s331_s4 = scalar_lea.hbm %s517_s1, 16  ;;  %s326_s2 = int_to_ptr.hbm [resolvable:$true] %s325_s2 }
  0x2c   : > { %s327_s17 = scalar_lea.hbm %s326_s2, 8  ;;  %p332_p0 = scmp.lt.s32.totalorder %s326_s2, %s517_s1 }
  0x2d   : > { %p328_p6 = scmp.ne.s32.totalorder %s326_s2, %s327_s17  ;;  %p333_p1 = scmp.lt.s32.totalorder %s331_s4, %s327_s17 }
  0x2f   : > { %p329_p9 = pnand %p328_p6, %p439_p11  ;;  %p334_p3 = por %p333_p1, %p332_p0 }
  0x31   : > { %p330_p13 = pneg %p329_p9 }
  0x33   : > { %p335_p4 = pnand %p334_p3, %p330_p13 }
  0x35   : > { %338 = shalt.err (!%p335_p4)
}
  0x36   : > { %237 = dma.vmem_to_hbm [thread:$0]  (%p439_p11), %s151_s28, 128, %s153_s29, %s138_s30  }
  0x37 PF: > { %s164_s13 = sand.u32 1, %s365_s6   ;;  %p523_p7 = scmp.ge.s32.totalorder %s377_s9, 2 }
  0x38   : > { %s165_s14 = scalar_lea.sflag [#allocation4], %s164_s13 }
  0x39   : > { %p244_p5 = pnand %p523_p7, %p443_p12 }
  0x3b   : > { %p245_p8 = pneg %p244_p5 }
  0x3d   : > { %360 = dma.done.wait (%p245_p8), %s165_s14, 128  }
  0x3e   : > { %362 = vsyncadd (%p245_p8), %s165_s14, 4294967168  ;;  %p14_p10 = scmp.ge.s32.totalorder %s414_s12, 4   ;;  %s524_s6 = smov %s369_s7 }
  0x3f   : > { %s525_s7 = smov %s373_s8  ;;  %s526_s8 = smov %s426_s15 }
  0x40   : > { %s527_s9 = smov %s414_s12  ;;  %16 = sbr.rel (!%p14_p10) target bundleno = 5 (0x5), region = 69 }
  0x45   :  { %171 = vsyncpa [#allocation3], 1 }
  0x46   :  { %173 = vsyncpa [#allocation3 + $0x1], 1 }
  0x47   :  { %174 = vsyncpa [#allocation4], 1 }
  0x48   :  { %176 = vsyncpa [#allocation4 + $0x1], 1 }

</bundles_post_ra>
